<compile_context>
chip_gen: v5e
topology: v5e:2x2
jax: 0.10.0
libtpu: 0.0.40
codegen_flags: <defaults>
</compile_context>

<pallas_src>
import math

import jax
import jax.numpy as jnp
import numpy as np
from jax.experimental import pallas as pl
from jax.experimental.pallas import tpu as pltpu


def _block_budget_bytes():
    """Per pred-block byte budget (Pallas double-buffers it)."""
    try:
        kind = jax.devices()[0].device_kind.lower()
    except Exception:
        kind = ""
    if "v7" in kind or "7x" in kind:
        # v7x HBM (~3.2 TB/s/TC) drains small blocks faster than the ~0.35us
        # per-step overhead; 2 x 8 MiB is still well under its 32 MiB scoped VMEM.
        return 8 * 1024 * 1024
    return 4 * 1024 * 1024


def _choose_fold(n, c):
    """Fold factor k: k consecutive rows fold into lanes -> folded width W = k*C."""
    if c >= 128:
        return 1                                   # already lane-dense enough
    best_k, best_score = 1, None
    for k in range(1, 17):
        if n % k:                                  # would force a pred copy
            continue
        w = k * c
        density = w / (((w + 127) // 128) * 128)
        score = (w >= 128, density, w)
        if best_score is None or score > best_score:
            best_k, best_score = k, score
    if best_score is not None and best_score[0] and best_score[1] >= 0.75:
        return best_k                              # divides N -> no pred padding
    # Rare fallback: exact lane-multiple fold; pads pred by < k rows.
    return max(1, min(16, math.lcm(c, 128) // c))


def _make_kernel(scale):
    def kernel(pred_ref, lhs_ref, rhs_ref, out_ref, acc_ref):
        i = pl.program_id(1)

        @pl.when(i == 0)
        def _init():
            acc_ref[...] = jnp.zeros_like(acc_ref)

        pred = pred_ref[...].astype(jnp.float32)           # (TILE_R, W)
        # MXU "expansion": d[r, w] = target(r, segment(w)) - (w mod C);
        # exactly 0 only at the target column, never 0 for the -1 sentinel.
        d = jnp.dot(lhs_ref[...], rhs_ref[...],
                    preferred_element_type=jnp.float32)    # (TILE_R, W)
        sel = jnp.where(d == 0.0, pred, 0.0)                # NaN/-inf safe select
        acc_ref[...] += jnp.sum(sel, axis=0, keepdims=True)

        @pl.when(i == pl.num_programs(1) - 1)
        def _finalize():
            total = jnp.sum(acc_ref[...]) * scale
            out_ref[...] = jnp.full(out_ref.shape, total, out_ref.dtype)

    return kernel


def nll_loss_pallas(pred, target, trans_feat=None, *, block_bytes=None):
    """Equivalent of F.nll_loss(pred, target) with mean reduction.

    pred:   (N, C) float log-probabilities (any float dtype, DMA'd natively).
    target: (N,)   integer class indices; anything outside [0, C) contributes 0.
    trans_feat: ignored (matches the PyTorch reference forward()).
    """
    del trans_feat
    n, c = pred.shape
    k = _choose_fold(n, c)

    # (Rare) pad so rows fold evenly; at most k-1 <= 15 rows.
    n_eff = -(-n // k) * k
    if n_eff != n:
        pred = jnp.pad(pred, ((0, n_eff - n), (0, 0)))
    r = n_eff // k
    w = k * c
    pred_folded = pred.reshape(r, w)                        # free row-major reshape

    # Row tiling of the folded view under the (chip-aware) byte budget.
    esize = jnp.dtype(pred.dtype).itemsize
    budget = block_bytes if block_bytes is not None else _block_budget_bytes()
    tile_r = max(16, (budget // (w * esize)) // 16 * 16)    # 16: bf16 sublane packing
    if r <= tile_r:
        tile_r, g = r, 1
    else:
        g = -(-r // tile_r)
    # 2-way row split across TensorCores for big grids (v7x); serial elsewhere.
    p = 2 if g >= 8 else 1
    gh = -(-g // p)
    r_sched = p * gh * tile_r                               # rows the schedule touches

    # Small exact-integer dtype for the MXU expansion (values <= C-1 <= 255 -> bf16).
    mm_dtype = jnp.bfloat16 if c <= 256 else jnp.float32

    # Sanitized per-row targets; -1 sentinel never matches (also used for padding,
    # including the off-the-end / garbage pred rows of the ragged last blocks).
    tgt = target.astype(jnp.int32).reshape(n)
    tgt = jnp.where((tgt >= 0) & (tgt < c), tgt, -1)
    tgt = jnp.pad(tgt, (0, r_sched * k - n), constant_values=-1)
    lhs = jnp.concatenate(
        [tgt.reshape(r_sched, k).astype(mm_dtype),
         jnp.ones((r_sched, 1), mm_dtype)],
        axis=1,
    )                                                       # (r_sched, k+1)

    # Static augmented expansion matrix: rows 0..k-1 = segment indicator E,
    # last row = -(w mod C).
    seg = np.arange(w) // c
    lc = np.arange(w) % c
    e = (seg[None, :] == np.arange(k)[:, None]).astype(np.float32)
    rhs = jnp.asarray(
        np.concatenate([e, -lc[None, :].astype(np.float32)], axis=0),
        dtype=mm_dtype)                                     # (k+1, w)

    last_blk = g - 1
    kernel = _make_kernel(-1.0 / n)

    out = pl.pallas_call(
        kernel,
        out_shape=jax.ShapeDtypeStruct((p, 1, 128), jnp.float32),
        grid_spec=pltpu.PrefetchScalarGridSpec(
            num_scalar_prefetch=0,
            grid=(p, gh),
            in_specs=[
                # pred: clamp so off-the-end steps re-read a valid block (their
                # sentinel targets zero out the contribution); last real block is
                # read ragged/clipped -- no full-size pad of pred.
                pl.BlockSpec(
                    (tile_r, w),
                    lambda pp, i: (jnp.minimum(pp * gh + i, last_blk), 0)),
                pl.BlockSpec((tile_r, k + 1), lambda pp, i: (pp * gh + i, 0)),
                pl.BlockSpec((k + 1, w), lambda pp, i: (0, 0)),   # resident constant
            ],
            out_specs=pl.BlockSpec((1, 1, 128), lambda pp, i: (pp, 0, 0)),
            scratch_shapes=[pltpu.VMEM((1, w), jnp.float32)],
        ),
        compiler_params=pltpu.CompilerParams(
            dimension_semantics=("parallel", "arbitrary")),
    )(pred_folded, lhs, rhs)

    # One partial (already scaled by -1/N) per core-split; tiny final sum.
    return jnp.sum(out[:, 0, 0])


def _reference_nll(pred, target):
    picked = jnp.take_along_axis(pred.astype(jnp.float32),
                                 target.astype(jnp.int32)[:, None], axis=1)
    return -jnp.mean(picked)


if __name__ == "__main__":
    key = jax.random.PRNGKey(0)
    k1, k2, k3, k4, k5, k6, k7, k8 = jax.random.split(key, 8)

    # Case 1: PointNet2-like small batch (single block, f32).
    n1, c1 = 32, 16
    pred1 = jax.nn.log_softmax(jax.random.normal(k1, (n1, c1), jnp.float32), axis=-1)
    tgt1 = jax.random.randint(k2, (n1,), 0, c1, dtype=jnp.int32)
    trans_feat = jax.random.normal(k3, (n1, 3, 3), jnp.float32)   # unused by loss
    loss1 = nll_loss_pallas(pred1, tgt1, trans_feat)
    jax.block_until_ready(loss1)
    assert jnp.allclose(loss1, _reference_nll(pred1, tgt1), atol=1e-5, rtol=1e-5)

    # Case 2: bf16 pred, C=40 (ModelNet40-like), N=30 -> divisor fold k=15.
    n2, c2 = 30, 40
    pred2 = jax.nn.log_softmax(
        jax.random.normal(k4, (n2, c2), jnp.float32), axis=-1).astype(jnp.bfloat16)
    tgt2 = jax.random.randint(k5, (n2,), 0, c2, dtype=jnp.int32)
    loss2 = nll_loss_pallas(pred2, tgt2, None)
    jax.block_until_ready(loss2)
    assert jnp.allclose(loss2, _reference_nll(pred2, tgt2), atol=1e-5, rtol=1e-5)

    # Case 3: prime N -> exercises the rare (<k rows) pred-pad fallback.
    n3, c3 = 37, 40
    pred3 = jax.nn.log_softmax(jax.random.normal(k6, (n3, c3), jnp.float32), axis=-1)
    tgt3 = jax.random.randint(k7, (n3,), 0, c3, dtype=jnp.int32)
    loss3 = nll_loss_pallas(pred3, tgt3, None)
    jax.block_until_ready(loss3)
    assert jnp.allclose(loss3, _reference_nll(pred3, tgt3), atol=1e-5, rtol=1e-5)

    # Case 4: force tiny blocks to exercise the multi-step grid, ragged last
    # block, index clamping, and the 2-way core split with small data.
    n4, c4 = 2080, 40
    pred4 = jax.nn.log_softmax(jax.random.normal(k8, (n4, c4), jnp.float32), axis=-1)
    tgt4 = jax.random.randint(k2, (n4,), 0, c4, dtype=jnp.int32)
    loss4 = nll_loss_pallas(pred4, tgt4, None, block_bytes=8 * 1024)
    jax.block_until_ready(loss4)
    assert jnp.allclose(loss4, _reference_nll(pred4, tgt4), atol=1e-4, rtol=1e-4)

    print("KERNEL_OK")
</pallas_src>

<mosaic_0001>
module attributes {stable_mosaic.version = 11 : i64} {
  func.func @kernel(%arg0: i32, %arg1: i32, %arg2: memref<2x256xf32, #tpu.memory_space<vmem>>, %arg3: memref<2x17xbf16, #tpu.memory_space<vmem>>, %arg4: memref<17x256xbf16, #tpu.memory_space<vmem>>, %arg5: memref<1x1x128xf32, #tpu.memory_space<vmem>>, %arg6: memref<1x256xf32, #tpu.memory_space<vmem>>) attributes {dimension_semantics = [#tpu.dimension_semantics<parallel>, #tpu.dimension_semantics<arbitrary>], iteration_bounds = array<i64: 1, 1>, scalar_prefetch = 0 : i64, scratch_operands = 1 : i64, tpu.core_type = #tpu.core_type<tc>, window_params = [{transform_indices = @transform_0, window_bounds = array<i64: 2, 256>}, {transform_indices = @transform_1, window_bounds = array<i64: 2, 17>}, {pipeline_mode = #tpu.pipeline_mode<synchronous>, transform_indices = @transform_2, window_bounds = array<i64: 17, 256>}, {transform_indices = @transform_3, window_bounds = array<i64: 1, 1, 128>}]} {
    %c0_i32 = arith.constant 0 : i32
    %0 = arith.cmpi eq, %arg1, %c0_i32 : i32
    %1 = arith.extui %0 : i1 to i32
    %c0_i32_0 = arith.constant 0 : i32
    %2 = arith.cmpi ne, %1, %c0_i32_0 : i32
    scf.if %2 {
      %cst_15 = arith.constant 0.000000e+00 : f32
      %19 = vector.broadcast %cst_15 : f32 to vector<1x256xf32>
      %c0_16 = arith.constant 0 : index
      %c0_17 = arith.constant 0 : index
      %20 = vector.load %arg6[%c0_16, %c0_17] : memref<1x256xf32, #tpu.memory_space<vmem>>, vector<1x256xf32>
      tpu.vector_store %arg6[%c0_16, %c0_17], %19 {strides = array<i32>} : memref<1x256xf32, #tpu.memory_space<vmem>>, vector<1x256xf32>,
    } else {
    }
    %c0 = arith.constant 0 : index
    %c0_1 = arith.constant 0 : index
    %3 = vector.load %arg2[%c0, %c0_1] : memref<2x256xf32, #tpu.memory_space<vmem>>, vector<2x256xf32>
    %c0_2 = arith.constant 0 : index
    %c0_3 = arith.constant 0 : index
    %4 = vector.load %arg3[%c0_2, %c0_3] : memref<2x17xbf16, #tpu.memory_space<vmem>>, vector<2x17xbf16>
    %c0_4 = arith.constant 0 : index
    %c0_5 = arith.constant 0 : index
    %5 = vector.load %arg4[%c0_4, %c0_5] : memref<17x256xbf16, #tpu.memory_space<vmem>>, vector<17x256xbf16>
    %cst = arith.constant dense<0.000000e+00> : vector<2x256xf32>
    %6 = tpu.matmul %4, %5, %cst {dimension_numbers = #tpu.dot_dimension_numbers<[1], [0], [0], [1], [0, 0, 1, 1], [], []>} : vector<2x17xbf16>, vector<17x256xbf16>, vector<2x256xf32> -> vector<2x256xf32>
    %cst_6 = arith.constant 0.000000e+00 : f32
    %7 = vector.broadcast %cst_6 : f32 to vector<2x256xf32>
    %8 = arith.cmpf oeq, %6, %7 : vector<2x256xf32>
    %cst_7 = arith.constant 0.000000e+00 : f32
    %9 = vector.broadcast %cst_7 : f32 to vector<2x256xf32>
    %10 = arith.select %8, %3, %9 : vector<2x256xi1>, vector<2x256xf32>
    %c0_8 = arith.constant 0 : index
    %c0_9 = arith.constant 0 : index
    %11 = vector.load %arg6[%c0_8, %c0_9] : memref<1x256xf32, #tpu.memory_space<vmem>>, vector<1x256xf32>
    %cst_10 = arith.constant dense<0.000000e+00> : vector<256xf32>
    %12 = vector.multi_reduction <add>, %10, %cst_10 [0] : vector<2x256xf32> to vector<256xf32>
    %13 = vector.shape_cast %12 : vector<256xf32> to vector<1x256xf32>
    %14 = arith.addf %11, %13 : vector<1x256xf32>
    %c0_11 = arith.constant 0 : index
    %c0_12 = arith.constant 0 : index
    %15 = vector.load %arg6[%c0_11, %c0_12] : memref<1x256xf32, #tpu.memory_space<vmem>>, vector<1x256xf32>
    tpu.vector_store %arg6[%c0_11, %c0_12], %14 {strides = array<i32>} : memref<1x256xf32, #tpu.memory_space<vmem>>, vector<1x256xf32>,
    %c0_i32_13 = arith.constant 0 : i32
    %16 = arith.cmpi eq, %arg1, %c0_i32_13 : i32
    %17 = arith.extui %16 : i1 to i32
    %c0_i32_14 = arith.constant 0 : i32
    %18 = arith.cmpi ne, %17, %c0_i32_14 : i32
    scf.if %18 {
      %c0_15 = arith.constant 0 : index
      %c0_16 = arith.constant 0 : index
      %19 = vector.load %arg6[%c0_15, %c0_16] : memref<1x256xf32, #tpu.memory_space<vmem>>, vector<1x256xf32>
      %20 = vector.shape_cast %19 : vector<1x256xf32> to vector<1x1x256xf32>
      %cst_17 = arith.constant dense<0.000000e+00> : vector<1xf32>
      %21 = vector.multi_reduction <add>, %20, %cst_17 [1, 2] : vector<1x1x256xf32> to vector<1xf32>
      %22 = vector.shape_cast %21 : vector<1xf32> to vector<1x1x1xf32>
      %23 = vector.extract %22[0, 0, 0] : f32 from vector<1x1x1xf32>
      %cst_18 = arith.constant -3.125000e-02 : f32
      %24 = arith.mulf %23, %cst_18 : f32
      %25 = vector.broadcast %24 : f32 to vector<1x1x128xf32>
      %c0_19 = arith.constant 0 : index
      %c0_20 = arith.constant 0 : index
      %c0_21 = arith.constant 0 : index
      %26 = vector.load %arg5[%c0_19, %c0_20, %c0_21] : memref<1x1x128xf32, #tpu.memory_space<vmem>>, vector<1x1x128xf32>
      tpu.vector_store %arg5[%c0_19, %c0_20, %c0_21], %25 {strides = array<i32>} : memref<1x1x128xf32, #tpu.memory_space<vmem>>, vector<1x1x128xf32>,
    } else {
    }
    return
  }
  func.func @transform_0(%arg0: i32, %arg1: i32) -> (i32, i32) {
    %c1_i32 = arith.constant 1 : i32
    %0 = arith.muli %arg0, %c1_i32 : i32
    %1 = arith.addi %0, %arg1 : i32
    %c0_i32 = arith.constant 0 : i32
    %2 = arith.minsi %1, %c0_i32 : i32
    %c0_i32_0 = arith.constant 0 : i32
    %c0_i32_1 = arith.constant 0 : i32
    return %2, %c0_i32_0 : i32, i32
  }
  func.func @transform_1(%arg0: i32, %arg1: i32) -> (i32, i32) {
    %c1_i32 = arith.constant 1 : i32
    %0 = arith.muli %arg0, %c1_i32 : i32
    %1 = arith.addi %0, %arg1 : i32
    %c0_i32 = arith.constant 0 : i32
    %c0_i32_0 = arith.constant 0 : i32
    return %1, %c0_i32 : i32, i32
  }
  func.func @transform_2(%arg0: i32, %arg1: i32) -> (i32, i32) {
    %c0_i32 = arith.constant 0 : i32
    %c0_i32_0 = arith.constant 0 : i32
    %c0_i32_1 = arith.constant 0 : i32
    return %c0_i32, %c0_i32_0 : i32, i32
  }
  func.func @transform_3(%arg0: i32, %arg1: i32) -> (i32, i32, i32) {
    %c0_i32 = arith.constant 0 : i32
    %c0_i32_0 = arith.constant 0 : i32
    %c0_i32_1 = arith.constant 0 : i32
    return %arg0, %c0_i32, %c0_i32_0 : i32, i32, i32
  }
}

</mosaic_0001>

<bundles_post_ra>
// kernel: tpu_custom_call.1
= control target key start
LH: loop header
LB: loop body
LE: loop exit
PB: predicated region body
PF: predicated region fallthrough
CT: control target
= control target key end

     0   :  { %8 = vsyncpa [#allocation4], 0  ;;  %s396_s0 = inlined_call_operand.hbm [shape: f32[2,256], index: 0, kind: input, shape index: {}]   ;;  %s397_s1 = inlined_call_operand.hbm [shape: bf16[2,17], index: 1, kind: input, shape index: {}]   ;;  %s398_s2 = inlined_call_operand.hbm [shape: bf16[17,256], index: 2, kind: input, shape index: {}]   ;;  %s399_s3 = inlined_call_operand.hbm [shape: f32[1,1,128], index: 3, kind: output, shape index: {}]  }
   0x1   :  { %9 = vsyncpa [#allocation7], 0  ;;  %s35_s14 = sshll.u32 %s397_s1, 4  ;;  %s36_s14 = int_to_ptr.hbm [resolvable:$true] %s35_s14 }
   0x2   :  { %10 = vsyncpa [#allocation5], 0  ;;  %s344_s15 = smov [#allocation6]   ;;  %s22_s19 = sshll.u32 %s396_s0, 4  ;;  %s23_s19 = int_to_ptr.hbm [resolvable:$true] %s22_s19 }
   0x3   :  { %s37_s16 = sshll.u32 %s344_s15, 4  ;;  %s345_s20 = smov [#allocation3]   ;;  %s38_s16 = int_to_ptr.vmem [resolvable:$true] %s37_s16 }
   0x4   :  { %40 = dma.hbm_to_vmem [thread:$0]  %s36_s14, 16, %s38_s16, [#allocation7]  }
   0x5   :  { %s24_s21 = sshll.u32 %s345_s20, 4  ;;  %s45_s24 = sshll.u32 %s398_s2, 4  ;;  %s25_s21 = int_to_ptr.vmem [resolvable:$true] %s24_s21  ;;  %s46_s24 = int_to_ptr.hbm [resolvable:$true] %s45_s24 }
   0x6   :  { %27 = dma.hbm_to_vmem [thread:$0]  %s23_s19, 64, %s25_s21, [#allocation4]  }
   0x7   :  { %s346_s1 = smov [#allocation8]   ;;  %s347_s26 = smov 128  }
   0x8   :  { %s47_s25 = sshll.u32 %s346_s1, 4  ;;  %s348_s27 = smov 8   ;;  %s48_s25 = int_to_ptr.vmem [resolvable:$true] %s47_s25 }
   0x9   :  { %53 = dma.hbm_to_vmem [thread:$0]  %s46_s24, 384, %s48_s25, [#allocation7], %s347_s26, %s347_s26, %s348_s27  }
   0xa   :  { %338 = dma.done.wait [#allocation4], 64  }
   0xb   :  { %339 = vsyncadd [#allocation4], 4294967232 }
   0xc   :  { %340 = dma.done.wait [#allocation7], 400  }
   0xd   :  { %341 = vsyncadd [#allocation7], 4294966896  ;;  %vm104_vm0 = vcmask 1040384   ;;  %v84_v0 = vld [vmem:[#allocation8 + $0x10] sm:$0x11]  ;;  %v349_v3 = vmov 0   ;;  %v75_v17 = vlaneseq }
   0xe   :  { %v92_v1 = vunpack.c.l.b16 %v84_v0  ;;  %v93_v2 = vunpack.c.h.b16 %v84_v0  ;;  %v106_v4 = vsel %vm104_vm0, 65535, %v349_v3  ;;  %v80_v5 = vld [vmem:[#allocation3] sm:$0xf]  ;;  %v222_v8 = vld [vmem:[#allocation8] sm:$0xf]  ;;  %vm100_vm1 = vcmask 138240  }
   0xf   :  { %142 = vst [vmem:[#allocation1] ss:$4 sm:$0xff] %v80_v5  ;;  %v231_v9 = vld [vmem:[#allocation8 + $0x4] sm:$0xf0]  ;;  %v230_v10 = vld [vmem:[#allocation8 + $0x4] sm:$0xf] }
  0x10   :  { %v96_v6 = vpack.c.b16 %v92_v1, %v92_v1  ;;  %v97_v7 = vpack.c.b16 %v93_v2, %v93_v2  ;;  %v224_v11 = vld [vmem:[#allocation8 + $0x8] sm:$0xf0]  ;;  %v223_v14 = vor.u32 %v231_v9, %v222_v8  ;;  %v81_v16 = vld [vmem:[#allocation6] sm:$0x1]  ;;  %vm382_vm2 = vcmp.lt.s32.totalorder %v75_v17, 256  ;;  %s351_s0 = smov [#allocation9]  }
  0x11   :  { %v227_v15 = vor.u32 %v230_v10, %v224_v11  ;;  %v350_v19 = vmov 0.0   ;;  %vm150_vm3 = vcmask 1041408   ;;  %s205_s2 = sshll.u32 %s351_s0, 4  ;;  %s207_s30 = sshll.u32 %s399_s3, 4  ;;  %s206_s2 = int_to_ptr.vmem [resolvable:$true] %s205_s2  ;;  %s208_s30 = int_to_ptr.hbm [resolvable:$true] %s207_s30 }
  0x12   :  { %v108_v12 = vand.u32 %v106_v4, %v96_v6  ;;  %v111_v13 = vand.u32 %v106_v4, %v97_v7  ;;  %79 = vst.msk [vmem:[#allocation2] sm:$0x3] %vm382_vm2, %v350_v19 }
  0x14   :  { %119 = vmatpush.bf16.msra.mxu0 %v108_v12  ;;  %132 = vmatpush.bf16.msra.mxu1 %v111_v13 }
  0x16   :  { %v143_v20 = vld.sshfl [vmem:[#allocation1] sm:$0xff pattern:$0x73625140]  ;;  %v144_v21 = vld.sshfl [vmem:[#allocation1 + $0x8] sm:$0xff pattern:$0x73625140] }
  0x18   :  { %120 = vmatpush.bf16.msra.mxu0 %v223_v14  ;;  %133 = vmatpush.bf16.msra.mxu1 %v227_v15 }
  0x19   :  { %v149_v42 = vld [vmem:[#allocation2] sm:$0x3] }
  0x1b   :  { %228 = vmatmul.msk.bf16.vlgmr.msra.gmra.mxu0 %vm100_vm1, %v81_v16  ;;  %229 = vmatmul.msk.bf16.vlgmr.msra.gmra.mxu1 %vm100_vm1, %v81_v16 }
  0x98   :  { %v122_v22 = vpop.f32.mrf.mxu0  ;;  %v135_v23 = vpop.f32.mrf.mxu1 }
  0x99   :  { %vm139_vm4 = vcmp.eq.f32.partialorder %v122_v22, 0.0  ;;  %vm140_vm5 = vcmp.eq.f32.partialorder %v135_v23, 0.0 }
  0x9a   :  { %v147_v24 = vsel %vm139_vm4, %v143_v20, 0.0  ;;  %v148_v25 = vsel %vm140_vm5, %v144_v21, 0.0 }
  0x9b   :  { %v151_v26 = vsel %vm150_vm3, %v147_v24, 0.0  ;;  %v158_v27 = vsel %vm150_vm3, %v148_v25, 0.0 }
  0x9c   :  { %v152_v28 = vrot.slane %v151_v26, 4  ;;  %v159_v29 = vrot.slane %v158_v27, 4 }
  0x9e   :  { %v153_v30 = vadd.f32 %v152_v28, %v151_v26  ;;  %v160_v31 = vadd.f32 %v159_v29, %v158_v27 }
  0xa0   :  { %v154_v32 = vrot.slane %v153_v30, 2  ;;  %v161_v33 = vrot.slane %v160_v31, 2  ;;  %v124_v34 = vpop.f32.mrf.mxu0  ;;  %v137_v35 = vpop.f32.mrf.mxu1 }
  0xa2   :  { %v155_v36 = vadd.f32 %v154_v32, %v153_v30  ;;  %v162_v37 = vadd.f32 %v161_v33, %v160_v31 }
  0xa4   :  { %v156_v38 = vrot.slane %v155_v36, 1  ;;  %v163_v39 = vrot.slane %v162_v37, 1 }
  0xa6   :  { %v164_v40 = vadd.f32 %v163_v39, %v162_v37  ;;  %v157_v41 = vadd.f32 %v156_v38, %v155_v36 }
  0xa8   :  { %v167_v43 = vrot.slane %v164_v40, 7 }
  0xaa   :  { %v168_v44 = vsel %vm104_vm0, %v157_v41, %v167_v43 }
  0xab   :  { %v170_v45 = vadd.f32 %v168_v44, %v149_v42 }
  0xad   :  { %175 = vst.msk [vmem:[#allocation2] sm:$0x3] %vm382_vm2, %v170_v45 }
  0xb4   :  { %v179_v46 = vld [vmem:[#allocation2] sm:$0x3] }
  0xb5   :  { %v181_v47 = vperm.slane %v179_v46, 0  ;;  %v182_v48 = vperm.slane %v179_v46, 1 }
  0xb7   :  { %v185_v49 = vsel %vm104_vm0, %v181_v47, 0.0  ;;  %v186_v50 = vsel %vm104_vm0, %v182_v48, 0.0 }
  0xb8   :  { %v187_v51 = vadd.f32 %v186_v50, %v185_v49 }
  0xba   :  { %188 = vadd.xlane.f32.xlu0 %v187_v51 }
 0x12d   :  { %v189_v52 = vpop.xlane.xlu0 %188 }
 0x12e   :  { %v190_v53 = vrot.slane %v189_v52, 4 }
 0x130   :  { %v191_v54 = vadd.f32 %v190_v53, %v189_v52 }
 0x132   :  { %v192_v55 = vrot.slane %v191_v54, 2 }
 0x134   :  { %v193_v56 = vadd.f32 %v192_v55, %v191_v54 }
 0x136   :  { %v194_v57 = vrot.slane %v193_v56, 1 }
 0x138   :  { %v195_v58 = vadd.f32 %v194_v57, %v193_v56 }
 0x13a   :  { %232 = vpush %v195_v58 }
 0x16b   :  { %s233_s4 = spop %232 }
 0x16c   :  { %s197_s5 = smul.f32 -0.03125, %s233_s4 }
 0x16e   :  { %v198_v59 = vstv %s197_s5 }
 0x16f   :  { %199 = vst [vmem:[#allocation9] sm:$0x1] %v198_v59 }
 0x170   :  { %210 = dma.vmem_to_hbm [thread:$0]  %s206_s2, 16, %s208_s30, [#allocation5]  }
 0x171   :  { %342 = dma.done.wait [#allocation5], 16  }
 0x172   :  { %343 = vsyncadd [#allocation5], 4294967280 }
 0x173   :  { %215 = vsyncpa [#allocation4], 1 }
 0x174   :  { %216 = vsyncpa [#allocation7], 1 }
 0x175   :  { %217 = vsyncpa [#allocation5], 1 }

</bundles_post_ra>
